<compile_context>
chip_gen: v7x
topology: tpu7x:2x2x1
jax: 0.10.0
libtpu: 0.0.40
codegen_flags: <defaults>
</compile_context>

<pallas_src>
import functools

import jax
import jax.numpy as jnp
from jax import lax
from jax.experimental import pallas as pl
from jax.experimental.pallas import tpu as pltpu


def _round_up(x, m):
    return (x + m - 1) // m * m


def _vis_logit_kernel(x_ref, w_ref, b_ref, o_ref, acc_ref, *, inv_hw):
    """One (batch-tile, hw-chunk) grid step of mean-pool + linear head.

    x_ref:   [TB, C, HWC]  input dtype (HWC a multiple of 128)
    w_ref:   [C, KP]       input dtype (KP a multiple of 128)
    b_ref:   [1, KP]       f32
    o_ref:   [TB, KP]      f32 (written on the last HW step only)
    acc_ref: [TB, C, 128]  f32 per-lane partial-sum accumulator (VMEM scratch)
    """
    k = pl.program_id(1)

    @pl.when(k == 0)
    def _():
        acc_ref[...] = jnp.zeros_like(acc_ref)

    # Chunked pooling: accumulate 128-lane partial sums elementwise in f32
    # (pure VPU adds; no [TB, C, HWC] f32 temp and no wide XLU reduce here).
    n_sub = x_ref.shape[-1] // 128

    def body(j, carry):
        start = pl.multiple_of(j * 128, 128)
        acc_ref[...] += x_ref[:, :, pl.ds(start, 128)].astype(jnp.float32)
        return carry

    lax.fori_loop(0, n_sub, body, 0, unroll=True)

    @pl.when(k == pl.num_programs(1) - 1)
    def _():
        # One 128-wide lane reduce per batch tile, mean scale in f32 (keeps
        # reference precision; no re-quantized weights), then the linear head
        # on the MXU with f32 accumulation.
        feat = jnp.sum(acc_ref[...], axis=-1) * inv_hw               # [TB, C]
        logits = jnp.dot(feat, w_ref[...].astype(jnp.float32),
                         preferred_element_type=jnp.float32)         # [TB, KP]
        o_ref[...] = logits + b_ref[...]


def bogomod_forward(images_nchw, w_ck, b_k, *, max_hw_chunk=2048):
    """Batched equivalent of bogomod.forward.

    images_nchw: [B, C, H, W]  (f32 or bf16)
    w_ck:        [C, K]        classifier weight (stored pre-transposed)
    b_k:         [K]           classifier bias
    returns:     [B, K] f32 logits; row b == vis_logit(image_b), so for B == 1
                 this equals logit.unsqueeze(0).
    """
    B, C, H, W = images_nchw.shape
    Cw, K = w_ck.shape
    assert Cw == C, (Cw, C)
    HW = H * W

    # ---- Padded, lane/sublane-aligned shapes --------------------------------
    B_pad = _round_up(B, 8)        # sublane-aligned batch tiles (no tb=B trap)
    HW_pad = _round_up(HW, 128)    # lane-aligned pooling axis
    K_pad = _round_up(K, 128)      # lane-dense output slab / full MXU columns

    x = images_nchw.reshape(B, C, HW)
    if (B_pad, HW_pad) != (B, HW):
        x = jnp.pad(x, ((0, B_pad - B), (0, 0), (0, HW_pad - HW)))
    w = w_ck if K_pad == K else jnp.pad(w_ck, ((0, 0), (0, K_pad - K)))
    b = jnp.pad(b_k.astype(jnp.float32), (0, K_pad - K)).reshape(1, K_pad)

    # ---- VMEM budget (generation-aware) --------------------------------------
    try:
        phys_vmem = int(pltpu.get_tpu_info().vmem_capacity_bytes)
    except Exception:
        phys_vmem = 64 * 1024 * 1024          # conservative: v7x per-TC VMEM
    vmem_limit = int(phys_vmem * 0.75)        # ~48 MiB v7x, ~96 MiB v5e/v6e
    tile_budget = int(vmem_limit * 0.75)      # headroom for compiler scratch

    x_item = x.dtype.itemsize
    w_item = w.dtype.itemsize

    def _tile_bytes(tb, hwc):
        return (2 * tb * C * hwc * x_item     # double-buffered image block
                + 2 * C * K_pad * w_item      # weight (conservatively x2)
                + 2 * K_pad * 4               # bias
                + 2 * tb * K_pad * 4          # output block
                + tb * C * 128 * 4)           # f32 accumulator scratch

    tb_cands = [t for t in (128, 64, 32, 16, 8) if t <= B_pad and B_pad % t == 0]
    m = HW_pad // 128
    hw_divs = sorted((128 * d for d in range(1, m + 1) if m % d == 0),
                     reverse=True)
    # Prefer HW chunks in the DMA sweet spot, largest first.
    hw_cands = ([d for d in hw_divs if d <= max_hw_chunk]
                + [d for d in hw_divs if d > max_hw_chunk])

    tb, hwc = tb_cands[-1], 128               # fallback: smallest tiles
    done = False
    for t in tb_cands:
        for h in hw_cands:
            if _tile_bytes(t, h) <= tile_budget:
                tb, hwc = t, h
                done = True
                break
        if done:
            break

    # v7x has 2 TensorCores: make sure the "parallel" batch axis has >= 2 grid
    # steps whenever the batch allows it.
    while B_pad // tb < 2 and tb >= 16:
        tb //= 2

    grid = (B_pad // tb, HW_pad // hwc)

    cost = pl.CostEstimate(
        flops=B_pad * C * HW_pad + 2 * B_pad * C * K_pad + B_pad * K_pad,
        transcendentals=0,
        bytes_accessed=(B_pad * C * HW_pad * x_item + C * K_pad * w_item
                        + K_pad * 4 + B_pad * K_pad * 4),
    )

    kernel = functools.partial(_vis_logit_kernel, inv_hw=1.0 / HW)

    out = pl.pallas_call(
        kernel,
        out_shape=jax.ShapeDtypeStruct((B_pad, K_pad), jnp.float32),
        grid_spec=pltpu.PrefetchScalarGridSpec(
            num_scalar_prefetch=0,
            grid=grid,
            in_specs=[
                pl.BlockSpec((tb, C, hwc), lambda i, k: (i, 0, k)),  # images
                pl.BlockSpec((C, K_pad), lambda i, k: (0, 0)),       # weight
                pl.BlockSpec((1, K_pad), lambda i, k: (0, 0)),       # bias
            ],
            out_specs=pl.BlockSpec((tb, K_pad), lambda i, k: (i, 0)),
            scratch_shapes=[pltpu.VMEM((tb, C, 128), jnp.float32)],
        ),
        compiler_params=pltpu.CompilerParams(
            dimension_semantics=("parallel", "arbitrary"),
            vmem_limit_bytes=vmem_limit),
        cost_estimate=cost,
    )(x, w, b)

    return out[:B, :K]


def _reference(images_nchw, w_ck, b_k):
    B, C = images_nchw.shape[:2]
    feat = jnp.mean(images_nchw.reshape(B, C, -1).astype(jnp.float32), axis=-1)
    return feat @ w_ck.astype(jnp.float32) + b_k.astype(jnp.float32)   # [B, K]


if __name__ == "__main__":
    key = jax.random.PRNGKey(0)
    k_img, k_w, k_b, k_img2, k_w2, k_b2 = jax.random.split(key, 6)

    # Case 1: shapes implied by the module's single-image forward, batched.
    B, C, H, W, K = 2, 4, 16, 16, 32
    image = jax.random.normal(k_img, (B, C, H, W), dtype=jnp.float32)
    w_ck = jax.random.normal(k_w, (C, K), dtype=jnp.float32) * 0.1
    b_k = jax.random.normal(k_b, (K,), dtype=jnp.float32) * 0.01

    out = jax.block_until_ready(bogomod_forward(image, w_ck, b_k))
    ref = _reference(image, w_ck, b_k)
    assert out.shape == (B, K), out.shape
    assert jnp.allclose(out, ref, atol=1e-4, rtol=1e-4), (
        float(jnp.max(jnp.abs(out - ref))))

    # Case 2: exercises batch/HW/K padding and the multi-step HW reduction
    # (max_hw_chunk=128 forces > 1 step on the "arbitrary" grid axis).
    B2, C2, H2, W2, K2 = 3, 8, 14, 14, 200
    image2 = jax.random.normal(k_img2, (B2, C2, H2, W2), dtype=jnp.float32)
    w2 = jax.random.normal(k_w2, (C2, K2), dtype=jnp.float32) * 0.1
    b2 = jax.random.normal(k_b2, (K2,), dtype=jnp.float32) * 0.01

    out2 = jax.block_until_ready(
        bogomod_forward(image2, w2, b2, max_hw_chunk=128))
    ref2 = _reference(image2, w2, b2)
    assert out2.shape == (B2, K2), out2.shape
    assert jnp.allclose(out2, ref2, atol=1e-4, rtol=1e-4), (
        float(jnp.max(jnp.abs(out2 - ref2))))

    print("KERNEL_OK")
</pallas_src>

<mosaic_0001>
module attributes {stable_mosaic.version = 11 : i64} {
  func.func @_vis_logit_kernel(%arg0: i32, %arg1: i32, %arg2: memref<8x4x256xf32, #tpu.memory_space<vmem>>, %arg3: memref<4x128xf32, #tpu.memory_space<vmem>>, %arg4: memref<1x128xf32, #tpu.memory_space<vmem>>, %arg5: memref<8x128xf32, #tpu.memory_space<vmem>>, %arg6: memref<8x4x128xf32, #tpu.memory_space<vmem>>) attributes {dimension_semantics = [#tpu.dimension_semantics<parallel>, #tpu.dimension_semantics<arbitrary>], iteration_bounds = array<i64: 1, 1>, scalar_prefetch = 0 : i64, scratch_operands = 1 : i64, tpu.core_type = #tpu.core_type<tc>, window_params = [{transform_indices = @transform_0, window_bounds = array<i64: 8, 4, 256>}, {pipeline_mode = #tpu.pipeline_mode<synchronous>, transform_indices = @transform_1, window_bounds = array<i64: 4, 128>}, {pipeline_mode = #tpu.pipeline_mode<synchronous>, transform_indices = @transform_2, window_bounds = array<i64: 1, 128>}, {transform_indices = @transform_3, window_bounds = array<i64: 8, 128>}]} {
    %c0_i32 = arith.constant 0 : i32
    %0 = arith.cmpi eq, %arg1, %c0_i32 : i32
    %1 = arith.extui %0 : i1 to i32
    %c0_i32_0 = arith.constant 0 : i32
    %2 = arith.cmpi ne, %1, %c0_i32_0 : i32
    scf.if %2 {
      %cst = arith.constant 0.000000e+00 : f32
      %20 = vector.broadcast %cst : f32 to vector<8x4x128xf32>
      %c0_20 = arith.constant 0 : index
      %c0_21 = arith.constant 0 : index
      %c0_22 = arith.constant 0 : index
      %21 = vector.load %arg6[%c0_20, %c0_21, %c0_22] : memref<8x4x128xf32, #tpu.memory_space<vmem>>, vector<8x4x128xf32>
      tpu.vector_store %arg6[%c0_20, %c0_21, %c0_22], %20 {strides = array<i32>} : memref<8x4x128xf32, #tpu.memory_space<vmem>>, vector<8x4x128xf32>,
    } else {
    }
    %c0_i32_1 = arith.constant 0 : i32
    %c128_i32 = arith.constant 128 : i32
    %3 = arith.muli %c0_i32_1, %c128_i32 : i32
    %4 = tpu.assume_multiple %3, 128 : i32
    %c0 = arith.constant 0 : index
    %c0_2 = arith.constant 0 : index
    %c0_3 = arith.constant 0 : index
    %5 = vector.load %arg6[%c0, %c0_2, %c0_3] : memref<8x4x128xf32, #tpu.memory_space<vmem>>, vector<8x4x128xf32>
    %c0_4 = arith.constant 0 : index
    %c0_5 = arith.constant 0 : index
    %6 = arith.index_cast %4 : i32 to index
    %7 = vector.load %arg2[%c0_4, %c0_5, %6] : memref<8x4x256xf32, #tpu.memory_space<vmem>>, vector<8x4x128xf32>
    %8 = arith.addf %5, %7 : vector<8x4x128xf32>
    %c0_6 = arith.constant 0 : index
    %c0_7 = arith.constant 0 : index
    %c0_8 = arith.constant 0 : index
    %9 = vector.load %arg6[%c0_6, %c0_7, %c0_8] : memref<8x4x128xf32, #tpu.memory_space<vmem>>, vector<8x4x128xf32>
    tpu.vector_store %arg6[%c0_6, %c0_7, %c0_8], %8 {strides = array<i32>} : memref<8x4x128xf32, #tpu.memory_space<vmem>>, vector<8x4x128xf32>,
    %c1_i32 = arith.constant 1 : i32
    %c128_i32_9 = arith.constant 128 : i32
    %10 = arith.muli %c1_i32, %c128_i32_9 : i32
    %11 = tpu.assume_multiple %10, 128 : i32
    %c0_10 = arith.constant 0 : index
    %c0_11 = arith.constant 0 : index
    %c0_12 = arith.constant 0 : index
    %12 = vector.load %arg6[%c0_10, %c0_11, %c0_12] : memref<8x4x128xf32, #tpu.memory_space<vmem>>, vector<8x4x128xf32>
    %c0_13 = arith.constant 0 : index
    %c0_14 = arith.constant 0 : index
    %13 = arith.index_cast %11 : i32 to index
    %14 = vector.load %arg2[%c0_13, %c0_14, %13] : memref<8x4x256xf32, #tpu.memory_space<vmem>>, vector<8x4x128xf32>
    %15 = arith.addf %12, %14 : vector<8x4x128xf32>
    %c0_15 = arith.constant 0 : index
    %c0_16 = arith.constant 0 : index
    %c0_17 = arith.constant 0 : index
    %16 = vector.load %arg6[%c0_15, %c0_16, %c0_17] : memref<8x4x128xf32, #tpu.memory_space<vmem>>, vector<8x4x128xf32>
    tpu.vector_store %arg6[%c0_15, %c0_16, %c0_17], %15 {strides = array<i32>} : memref<8x4x128xf32, #tpu.memory_space<vmem>>, vector<8x4x128xf32>,
    %c2_i32 = arith.constant 2 : i32
    %c0_i32_18 = arith.constant 0 : i32
    %17 = arith.cmpi eq, %arg1, %c0_i32_18 : i32
    %18 = arith.extui %17 : i1 to i32
    %c0_i32_19 = arith.constant 0 : i32
    %19 = arith.cmpi ne, %18, %c0_i32_19 : i32
    scf.if %19 {
      %c0_20 = arith.constant 0 : index
      %c0_21 = arith.constant 0 : index
      %c0_22 = arith.constant 0 : index
      %20 = vector.load %arg6[%c0_20, %c0_21, %c0_22] : memref<8x4x128xf32, #tpu.memory_space<vmem>>, vector<8x4x128xf32>
      %cst = arith.constant dense<0.000000e+00> : vector<8x4xf32>
      %21 = vector.multi_reduction <add>, %20, %cst [2] : vector<8x4x128xf32> to vector<8x4xf32>
      %cst_23 = arith.constant 3.906250e-03 : f32
      %22 = vector.broadcast %cst_23 : f32 to vector<8x4xf32>
      %23 = arith.mulf %21, %22 : vector<8x4xf32>
      %c0_24 = arith.constant 0 : index
      %c0_25 = arith.constant 0 : index
      %24 = vector.load %arg3[%c0_24, %c0_25] : memref<4x128xf32, #tpu.memory_space<vmem>>, vector<4x128xf32>
      %cst_26 = arith.constant dense<0.000000e+00> : vector<8x128xf32>
      %25 = tpu.matmul %23, %24, %cst_26 {dimension_numbers = #tpu.dot_dimension_numbers<[1], [0], [0], [1], [0, 0, 1, 1], [], []>} : vector<8x4xf32>, vector<4x128xf32>, vector<8x128xf32> -> vector<8x128xf32>
      %c0_27 = arith.constant 0 : index
      %c0_28 = arith.constant 0 : index
      %26 = vector.load %arg4[%c0_27, %c0_28] : memref<1x128xf32, #tpu.memory_space<vmem>>, vector<1x128xf32>
      %27 = vector.broadcast %26 : vector<1x128xf32> to vector<8x128xf32>
      %28 = arith.addf %25, %27 : vector<8x128xf32>
      %c0_29 = arith.constant 0 : index
      %c0_30 = arith.constant 0 : index
      %29 = vector.load %arg5[%c0_29, %c0_30] : memref<8x128xf32, #tpu.memory_space<vmem>>, vector<8x128xf32>
      tpu.vector_store %arg5[%c0_29, %c0_30], %28 {strides = array<i32>} : memref<8x128xf32, #tpu.memory_space<vmem>>, vector<8x128xf32>,
    } else {
    }
    return
  }
  func.func @transform_0(%arg0: i32, %arg1: i32) -> (i32, i32, i32) {
    %c0_i32 = arith.constant 0 : i32
    %c0_i32_0 = arith.constant 0 : i32
    return %arg0, %c0_i32, %arg1 : i32, i32, i32
  }
  func.func @transform_1(%arg0: i32, %arg1: i32) -> (i32, i32) {
    %c0_i32 = arith.constant 0 : i32
    %c0_i32_0 = arith.constant 0 : i32
    %c0_i32_1 = arith.constant 0 : i32
    return %c0_i32, %c0_i32_0 : i32, i32
  }
  func.func @transform_2(%arg0: i32, %arg1: i32) -> (i32, i32) {
    %c0_i32 = arith.constant 0 : i32
    %c0_i32_0 = arith.constant 0 : i32
    %c0_i32_1 = arith.constant 0 : i32
    return %c0_i32, %c0_i32_0 : i32, i32
  }
  func.func @transform_3(%arg0: i32, %arg1: i32) -> (i32, i32) {
    %c0_i32 = arith.constant 0 : i32
    %c0_i32_0 = arith.constant 0 : i32
    return %arg0, %c0_i32 : i32, i32
  }
}

</mosaic_0001>

<bundles_post_ra>
// kernel: tpu_custom_call.1
= control target key start
LH: loop header
LB: loop body
LE: loop exit
PB: predicated region body
PF: predicated region fallthrough
CT: control target
= control target key end

     0   :  { %8 = vsyncpa [#allocation4], 0  ;;  %s493_s0 = inlined_call_operand.hbm [shape: f32[8,4,256], index: 0, kind: input, shape index: {}]   ;;  %s494_s1 = inlined_call_operand.hbm [shape: f32[4,128], index: 1, kind: input, shape index: {}]   ;;  %s495_s2 = inlined_call_operand.vmem [shape: f32[1,128], index: 2, kind: input, shape index: {}]   ;;  %s496_s3 = inlined_call_operand.hbm [shape: f32[8,128], index: 3, kind: output, shape index: {}]  }
   0x1   :  { %9 = vsyncpa [#allocation7], 0 }
   0x2   :  { %10 = vsyncpa [#allocation5], 0  ;;  %s408_s12 = smov [#allocation3]   ;;  %s336_s16 = scalar_lea.hbm %s493_s0, 1024 }
   0x3   :  { %s16_s13 = sshll.u32 %s408_s12, 4  ;;  %p337_p0 = scmp.ne.s32.totalorder %s493_s0, %s336_s16  ;;  %s17_s13 = int_to_ptr.vmem [resolvable:$true] %s16_s13 }
   0x4   :  { %p340_p1 = scmp.lt.u32.totalorder %s336_s16, %s493_s0 }
   0x6   :  { %p342_p2 = pnand %p340_p1, %p337_p0 }
   0x8   :  { %345 = shalt.err (!%p342_p2)
}
   0x9   :  { %s346_s21 = scalar_lea.vmem %s17_s13, 1024  ;;  %p351_p4 = scmp.lt.s32.totalorder %s17_s13, %s17_s13 }
   0xa   :  { %p347_p3 = scmp.ne.s32.totalorder %s17_s13, %s346_s21  ;;  %p352_p5 = scmp.lt.s32.totalorder %s346_s21, %s346_s21 }
   0xc   :  { %p353_p6 = por %p352_p5, %p351_p4 }
   0xe   :  { %p354_p7 = pnand %p353_p6, %p347_p3 }
  0x10   :  { %357 = shalt.err (!%p354_p7)
}
  0x11   :  { %s409_s22 = smov 128   ;;  %s410_s23 = smov 8  }
  0x12   :  { %22 = dma.hbm_to_vmem [thread:$0]  %s493_s0, 1024, %s17_s13, [#allocation4], %s409_s22, %s409_s22, %s410_s23  }
  0x13   :  { %s411_s26 = smov [#allocation6]   ;;  %s358_s30 = scalar_lea.hbm %s494_s1, 64 }
  0x14   :  { %s29_s27 = sshll.u32 %s411_s26, 4  ;;  %p359_p8 = scmp.ne.s32.totalorder %s494_s1, %s358_s30  ;;  %s30_s27 = int_to_ptr.vmem [resolvable:$true] %s29_s27 }
  0x15   :  { %p362_p9 = scmp.lt.u32.totalorder %s358_s30, %s494_s1 }
  0x17   :  { %p364_p10 = pnand %p362_p9, %p359_p8 }
  0x19   :  { %367 = shalt.err (!%p364_p10)
}
  0x1a   :  { %s368_s8 = scalar_lea.vmem %s30_s27, 64  ;;  %p373_p12 = scmp.lt.s32.totalorder %s30_s27, %s30_s27 }
  0x1b   :  { %p369_p11 = scmp.ne.s32.totalorder %s30_s27, %s368_s8  ;;  %p374_p13 = scmp.lt.s32.totalorder %s368_s8, %s368_s8 }
  0x1d   :  { %p375_p0 = por %p374_p13, %p373_p12 }
  0x1f   :  { %p376_p1 = pnand %p375_p0, %p369_p11 }
  0x21   :  { %379 = shalt.err (!%p376_p1)
}
  0x22   :  { %32 = dma.hbm_to_vmem [thread:$0]  %s494_s1, 64, %s30_s27, [#allocation7]  }
  0x23   :  { %402 = dma.done.wait [#allocation4], 1024  }
  0x24   :  { %403 = vsyncadd [#allocation4], 4294966272 }
  0x25   :  { %404 = dma.done.wait [#allocation7], 64  }
  0x26   :  { %405 = vsyncadd [#allocation7], 4294967232  ;;  %v412_v0 = vmov 0.0   ;;  %v61_v1 = vld [vmem:[#allocation3] sm:$0xf]  ;;  %vm129_vm0 = vcmask 1043456  }
  0x27   :  { %45 = vst [vmem:[#allocation2] sm:$0xf] %v412_v0  ;;  %46 = vst [vmem:[#allocation2 + $0x4] sm:$0xf] %v412_v0  ;;  %324 = vmatprep.subr.mxu0 %v412_v0  ;;  %v63_v2 = vld [vmem:[#allocation3 + $0x10] sm:$0xf] }
  0x28   :  { %47 = vst [vmem:[#allocation2 + $0x8] sm:$0xf] %v412_v0  ;;  %48 = vst [vmem:[#allocation2 + $0xc] sm:$0xf] %v412_v0  ;;  %v62_v8 = vld [vmem:[#allocation3 + $0x8] sm:$0xf] }
  0x29   :  { %49 = vst [vmem:[#allocation2 + $0x10] sm:$0xf] %v412_v0  ;;  %50 = vst [vmem:[#allocation2 + $0x14] sm:$0xf] %v412_v0  ;;  %v64_v11 = vld [vmem:[#allocation3 + $0x18] sm:$0xf] }
  0x2a   :  { %51 = vst [vmem:[#allocation2 + $0x18] sm:$0xf] %v412_v0  ;;  %52 = vst [vmem:[#allocation2 + $0x1c] sm:$0xf] %v412_v0  ;;  %v65_v14 = vld [vmem:[#allocation3 + $0x20] sm:$0xf] }
  0x2b   :  { %v66_v17 = vld [vmem:[#allocation3 + $0x28] sm:$0xf]  ;;  %v67_v20 = vld [vmem:[#allocation3 + $0x30] sm:$0xf]  ;;  %v68_v23 = vld [vmem:[#allocation3 + $0x38] sm:$0xf] }
  0x2c   :  { %v94_v25 = vld [vmem:[#allocation3 + $0x4] sm:$0xf]  ;;  %v96_v26 = vld [vmem:[#allocation3 + $0x14] sm:$0xf]  ;;  %v95_v27 = vld [vmem:[#allocation3 + $0xc] sm:$0xf] }
  0x2d   :  { %v97_v30 = vld [vmem:[#allocation3 + $0x1c] sm:$0xf]  ;;  %v98_v34 = vld [vmem:[#allocation3 + $0x24] sm:$0xf]  ;;  %v99_v37 = vld [vmem:[#allocation3 + $0x2c] sm:$0xf] }
  0x2e   :  { %v53_v3 = vld [vmem:[#allocation2] sm:$0xf]  ;;  %v54_v7 = vld [vmem:[#allocation2 + $0x4] sm:$0xf]  ;;  %v100_v40 = vld [vmem:[#allocation3 + $0x34] sm:$0xf] }
  0x2f   :  { %v55_v4 = vld [vmem:[#allocation2 + $0x8] sm:$0xf]  ;;  %v69_v5 = vadd.f32 %v61_v1, %v53_v3  ;;  %v70_v9 = vadd.f32 %v62_v8, %v54_v7  ;;  %v56_v10 = vld [vmem:[#allocation2 + $0xc] sm:$0xf]  ;;  %v101_v43 = vld [vmem:[#allocation3 + $0x3c] sm:$0xf]  ;;  %v178_v3 = vlaneseq }
  0x30   :  { %v71_v6 = vadd.f32 %v63_v2, %v55_v4  ;;  %v72_v12 = vadd.f32 %v64_v11, %v56_v10  ;;  %v57_v13 = vld [vmem:[#allocation2 + $0x10] sm:$0xf]  ;;  %v58_v16 = vld [vmem:[#allocation2 + $0x14] sm:$0xf]  ;;  %v162_v2 = vld [vmem:[#allocation6] sm:$0xf] }
  0x31   :  { %77 = vst [vmem:[#allocation2] sm:$0xf] %v69_v5  ;;  %78 = vst [vmem:[#allocation2 + $0x4] sm:$0xf] %v70_v9  ;;  %v73_v15 = vadd.f32 %v65_v14, %v57_v13  ;;  %v74_v18 = vadd.f32 %v66_v17, %v58_v16  ;;  %v59_v19 = vld [vmem:[#allocation2 + $0x18] sm:$0xf]  ;;  %325 = vmatpush3.msk.msra.mxu0 %vm129_vm0, %v162_v2 }
  0x32   :  { %79 = vst [vmem:[#allocation2 + $0x8] sm:$0xf] %v71_v6  ;;  %80 = vst [vmem:[#allocation2 + $0xc] sm:$0xf] %v72_v12  ;;  %v75_v21 = vadd.f32 %v67_v20, %v59_v19  ;;  %v60_v22 = vld [vmem:[#allocation2 + $0x1c] sm:$0xf] }
  0x33   :  { %81 = vst [vmem:[#allocation2 + $0x10] sm:$0xf] %v73_v15  ;;  %82 = vst [vmem:[#allocation2 + $0x14] sm:$0xf] %v74_v18  ;;  %v76_v24 = vadd.f32 %v68_v23, %v60_v22  ;;  %vm413_vm1 = vmmov 0   ;;  %v179_v4 = vand.u32 127, %v178_v3 }
  0x34   :  { %83 = vst [vmem:[#allocation2 + $0x18] sm:$0xf] %v75_v21  ;;  %326 = vmatprep.mubr.msk.f32.mxu0 %vm413_vm1, %v412_v0  ;;  %v181_v5 = vshrl.u32 %v178_v3, 7  ;;  %vm212_vm2 = vcmask 1041409   ;;  %vm214_vm3 = vcmask 1042434   ;;  %vm216_vm4 = vcmask 1043459  }
  0x35   :  { %84 = vst [vmem:[#allocation2 + $0x1c] sm:$0xf] %v76_v24  ;;  %vm218_vm5 = vcmask 1044484   ;;  %vm220_vm6 = vcmask 1045509   ;;  %vm222_vm7 = vcmask 1046534   ;;  %vm224_vm8 = vcmask 1047559  }
  0x36   :  { %v182_v8 = vsub.s32 %v179_v4, %v181_v5  ;;  %vm226_vm9 = vcmask 31744   ;;  %s414_s11 = smov [#allocation8]  }
  0x37   :  { %s309_s12 = sshll.u32 %s414_s11, 4  ;;  %s310_s12 = int_to_ptr.vmem [resolvable:$true] %s309_s12 }
  0x38   :  { %v85_v28 = vld [vmem:[#allocation2] sm:$0xf]  ;;  %v86_v33 = vld [vmem:[#allocation2 + $0x4] sm:$0xf]  ;;  %s380_s13 = scalar_lea.vmem %s310_s12, 128  ;;  %p385_p3 = scmp.lt.s32.totalorder %s310_s12, %s310_s12 }
  0x39   :  { %v87_v29 = vld [vmem:[#allocation2 + $0x8] sm:$0xf]  ;;  %v102_v31 = vadd.f32 %v94_v25, %v85_v28  ;;  %v103_v35 = vadd.f32 %v95_v27, %v86_v33  ;;  %v88_v36 = vld [vmem:[#allocation2 + $0xc] sm:$0xf]  ;;  %p381_p2 = scmp.ne.s32.totalorder %s310_s12, %s380_s13  ;;  %p386_p4 = scmp.lt.s32.totalorder %s380_s13, %s380_s13 }
  0x3a   :  { %v104_v32 = vadd.f32 %v96_v26, %v87_v29  ;;  %v105_v38 = vadd.f32 %v97_v30, %v88_v36  ;;  %v89_v39 = vld [vmem:[#allocation2 + $0x10] sm:$0xf]  ;;  %v90_v42 = vld [vmem:[#allocation2 + $0x14] sm:$0xf] }
  0x3b   :  { %110 = vst [vmem:[#allocation2] sm:$0xf] %v102_v31  ;;  %111 = vst [vmem:[#allocation2 + $0x4] sm:$0xf] %v103_v35  ;;  %v106_v41 = vadd.f32 %v98_v34, %v89_v39  ;;  %v107_v44 = vadd.f32 %v99_v37, %v90_v42  ;;  %v91_v45 = vld [vmem:[#allocation2 + $0x18] sm:$0xf]  ;;  %p387_p5 = por %p386_p4, %p385_p3 }
  0x3c   :  { %112 = vst [vmem:[#allocation2 + $0x8] sm:$0xf] %v104_v32  ;;  %113 = vst [vmem:[#allocation2 + $0xc] sm:$0xf] %v105_v38  ;;  %v108_v46 = vadd.f32 %v100_v40, %v91_v45  ;;  %v92_v47 = vld [vmem:[#allocation2 + $0x1c] sm:$0xf] }
  0x3d   :  { %114 = vst [vmem:[#allocation2 + $0x10] sm:$0xf] %v106_v41  ;;  %115 = vst [vmem:[#allocation2 + $0x14] sm:$0xf] %v107_v44  ;;  %v109_v48 = vadd.f32 %v101_v43, %v92_v47  ;;  %v319_v37 = vld [vmem:[%s495_s2] ss:$0 sm:$0xff]  ;;  %p388_p6 = pnand %p387_p5, %p381_p2 }
  0x3e   :  { %116 = vst [vmem:[#allocation2 + $0x18] sm:$0xf] %v108_v46 }
  0x3f   :  { %117 = vst [vmem:[#allocation2 + $0x1c] sm:$0xf] %v109_v48 }
  0x42   :  { %v121_v49 = vld [vmem:[#allocation2] sm:$0xf]  ;;  %v122_v53 = vld [vmem:[#allocation2 + $0x4] sm:$0xf] }
  0x43   :  { %v123_v50 = vld [vmem:[#allocation2 + $0x8] sm:$0xf]  ;;  %v130_v51 = vsel %vm129_vm0, %v121_v49, 0.0  ;;  %v124_v54 = vld [vmem:[#allocation2 + $0xc] sm:$0xf]  ;;  %v133_v55 = vsel %vm129_vm0, %v122_v53, 0.0 }
  0x44   :  { %v136_v52 = vsel %vm129_vm0, %v123_v50, 0.0  ;;  %131 = vadd.xlane.f32.xlu0 %v130_v51  ;;  %v139_v56 = vsel %vm129_vm0, %v124_v54, 0.0  ;;  %v125_v57 = vld [vmem:[#allocation2 + $0x10] sm:$0xf]  ;;  %v126_v58 = vld [vmem:[#allocation2 + $0x14] sm:$0xf] }
  0x45   :  { %137 = vadd.xlane.f32.xlu1 %v136_v52  ;;  %v142_v59 = vsel %vm129_vm0, %v125_v57, 0.0  ;;  %v145_v60 = vsel %vm129_vm0, %v126_v58, 0.0  ;;  %v127_v61 = vld [vmem:[#allocation2 + $0x18] sm:$0xf] }
  0x46   :  { %v128_v62 = vld [vmem:[#allocation2 + $0x1c] sm:$0xf]  ;;  %v148_v63 = vsel %vm129_vm0, %v127_v61, 0.0 }
  0x47   :  { %v151_v1 = vsel %vm129_vm0, %v128_v62, 0.0 }
  0x48   :  { %134 = vadd.xlane.f32.xlu0 %v133_v55 }
  0x49   :  { %140 = vadd.xlane.f32.xlu1 %v139_v56 }
  0x4c   :  { %143 = vadd.xlane.f32.xlu0 %v142_v59 }
  0x4d   :  { %146 = vadd.xlane.f32.xlu1 %v145_v60 }
  0x50   :  { %149 = vadd.xlane.f32.xlu0 %v148_v63 }
  0x51   :  { %152 = vadd.xlane.f32.xlu1 %v151_v1 }
  0xd1   :  { %v132_v6 = vpop.xlane.xlu0 %131 }
  0xd2   :  { %v138_v7 = vpop.xlane.xlu1 %137  ;;  %v154_v9 = vmul.f32 0.00390625, %v132_v6 }
  0xd3   :  { %v156_v10 = vmul.f32 0.00390625, %v138_v7 }
  0xd4   :  { %v183_v15 = vrot.slane %v154_v9, %v182_v8 }
  0xd5   :  { %v135_v11 = vpop.xlane.xlu0 %134  ;;  %v191_v18 = vrot.slane %v156_v10, %v182_v8 }
  0xd6   :  { %v141_v12 = vpop.xlane.xlu1 %140  ;;  %v155_v13 = vmul.f32 0.00390625, %v135_v11 }
  0xd7   :  { %v157_v14 = vmul.f32 0.00390625, %v141_v12 }
  0xd8   :  { %v187_v16 = vrot.slane %v155_v13, %v182_v8 }
  0xd9   :  { %v195_v17 = vrot.slane %v157_v14, %v182_v8  ;;  %v144_v0 = vpop.xlane.xlu0 %143 }
  0xda   :  { %v147_v19 = vpop.xlane.xlu1 %146  ;;  %v213_v20 = vsel %vm212_vm2, %v187_v16, %v183_v15  ;;  %v158_v21 = vmul.f32 0.00390625, %v144_v0 }
  0xdb   :  { %v159_v22 = vmul.f32 0.00390625, %v147_v19  ;;  %v215_v23 = vsel %vm214_vm3, %v191_v18, %v213_v20 }
  0xdc   :  { %v217_v24 = vsel %vm216_vm4, %v195_v17, %v215_v23  ;;  %v199_v25 = vrot.slane %v158_v21, %v182_v8 }
  0xdd   :  { %v203_v26 = vrot.slane %v159_v22, %v182_v8  ;;  %v150_v27 = vpop.xlane.xlu0 %149 }
  0xde   :  { %v153_v28 = vpop.xlane.xlu1 %152  ;;  %v219_v29 = vsel %vm218_vm5, %v199_v25, %v217_v24  ;;  %v160_v30 = vmul.f32 0.00390625, %v150_v27 }
  0xdf   :  { %v161_v31 = vmul.f32 0.00390625, %v153_v28  ;;  %v221_v34 = vsel %vm220_vm6, %v203_v26, %v219_v29 }
  0xe0   :  { %v207_v32 = vrot.slane %v160_v30, %v182_v8 }
  0xe1   :  { %v211_v33 = vrot.slane %v161_v31, %v182_v8 }
  0xe2   :  { %v223_v35 = vsel %vm222_vm7, %v207_v32, %v221_v34 }
  0xe3   :  { %v225_v36 = vsel %vm224_vm8, %v211_v33, %v223_v35 }
  0xe4   :  { %327 = vmatmul.mubr.msk.f32.vlgmr.msra.gmra.mrb[0].mxu0 %vm226_vm9, %v225_v36 }
 0x1b7   :  { %v298_v38 = vpop.f32.mrb[0].mxu0 }
 0x1b8   :  { %v299_v39 = vadd.f32 %v319_v37, %v298_v38  ;;  %v328_v40 = vpop.f32.mrb[1].mxu0 }
 0x1ba   :  { %302 = vst [vmem:[#allocation8] sm:$0xff] %v299_v39 }
 0x1bb   :  { %391 = shalt.err (!%p388_p6)
}
 0x1bc   :  { %s392_s16 = scalar_lea.hbm %s496_s3, 128 }
 0x1bd   :  { %p393_p7 = scmp.ne.s32.totalorder %s496_s3, %s392_s16  ;;  %p396_p8 = scmp.lt.u32.totalorder %s392_s16, %s496_s3 }
 0x1bf   :  { %p398_p9 = pnand %p396_p8, %p393_p7 }
 0x1c1   :  { %401 = shalt.err (!%p398_p9)
}
 0x1c2   :  { %312 = dma.vmem_to_hbm [thread:$0]  %s310_s12, 128, %s496_s3, [#allocation5]  }
 0x1c3   :  { %406 = dma.done.wait [#allocation5], 128  }
 0x1c4   :  { %407 = vsyncadd [#allocation5], 4294967168 }
 0x1c5   :  { %316 = vsyncpa [#allocation4], 1 }
 0x1c6   :  { %317 = vsyncpa [#allocation7], 1 }
 0x1c7   :  { %318 = vsyncpa [#allocation5], 1 }

</bundles_post_ra>
